<compile_context>
chip_gen: v5e
topology: v5e:2x2
jax: 0.10.0
libtpu: 0.0.40
codegen_flags: <defaults>
</compile_context>

<pallas_src>
import jax
import jax.numpy as jnp
from jax import lax
from jax.experimental import pallas as pl
from jax.experimental.pallas import tpu as pltpu


# ----------------------------------------------------------------------------
# Fused kernel: transposed im2col-matmul conv + global max/min pool + MLP
# ----------------------------------------------------------------------------
def cnniqa_kernel(p_ref, wc_ref, w1_ref, w2_ref, sm_ref, out_ref):
    # p_ref : (1, CKK, Bt*Pp)  transposed patches (Bt images side by side on lanes)
    # wc_ref: (NK, CKK)        flattened conv weight (OIHW order)
    # w1_ref: (2, NK, n1)      fc1 split: [0] acts on max-pool, [1] on min-pool
    # w2_ref: (n1, n2)
    # sm_ref: (8, Wd)          row0=b1_eff, row1=b2, row2=w3, row3[0]=b3
    # out_ref: (1, Bt, NO)     fused lane-dense slab: [:, :n2]=h, [:, n2]=q
    NK, _ = wc_ref.shape
    n1 = w1_ref.shape[2]
    n2 = w2_ref.shape[1]
    Bt = out_ref.shape[1]
    NO = out_ref.shape[2]
    Pp = p_ref.shape[2] // Bt

    # ---- conv as ONE MXU matmul with the patch dim on the lane axis
    conv = jnp.dot(wc_ref[...], p_ref[0],
                   preferred_element_type=jnp.float32)        # (NK, Bt*Pp)
    conv = conv.reshape(NK, Bt, Pp)                           # 128-aligned split

    # ---- global max/min pooling = dense lane reduction
    # (conv bias folded into fc1 bias in the wrapper; padded patch columns are
    #  edge-duplicates of valid patches, so max AND min stay exact.)
    h1 = jnp.max(conv, axis=2)                                # (NK, Bt)
    h2 = jnp.min(conv, axis=2)                                # (NK, Bt)

    # ---- MLP: fc1 -> relu -> (dropout=id) -> fc2 -> relu -> fc3
    dn = (((0,), (0,)), ((), ()))                             # contract over NK
    a1 = (lax.dot_general(h1, w1_ref[0], dn, preferred_element_type=jnp.float32)
          + lax.dot_general(h2, w1_ref[1], dn, preferred_element_type=jnp.float32)
          + sm_ref[0:1, 0:n1])                                # (Bt, n1)
    a1 = jnp.maximum(a1, 0.0)
    # TODO(synk): nn.Dropout treated as identity (inference/eval semantics).
    a2 = jnp.maximum(
        jnp.dot(a1, w2_ref[...], preferred_element_type=jnp.float32)
        + sm_ref[1:2, 0:n2], 0.0)                             # (Bt, n2)
    q = (jnp.sum(a2 * sm_ref[2:3, 0:n2], axis=1, keepdims=True)
         + sm_ref[3:4, 0:1])                                  # (Bt, 1)

    # ---- single lane-dense output slab: [h | q | zero pad]
    pieces = [a2, q]
    pad_cols = NO - n2 - 1
    if pad_cols > 0:
        pieces.append(jnp.zeros((Bt, pad_cols), jnp.float32))
    out_ref[0] = jnp.concatenate(pieces, axis=1)


# ----------------------------------------------------------------------------
# Wrapper
# ----------------------------------------------------------------------------
def _round_up(v, m):
    return ((v + m - 1) // m) * m


def cnniqa_forward(x, params, block_b=None):
    B, C, H, W = x.shape
    wc = params["conv_w"]                      # (NK, C, KH, KW)  PyTorch OIHW
    bc = params["conv_b"]                      # (NK,)
    NK, _, KH, KW = wc.shape
    n1 = params["w1"].shape[1]
    n2 = params["w2"].shape[1]
    CKK = C * KH * KW
    OH, OW = H - KH + 1, W - KW + 1
    P = OH * OW
    Pp = _round_up(P, 128)                     # patch dim on lanes, 128-aligned

    # ---- batch blocking: amortize per-step overhead, respect v7x's 64 MiB VMEM,
    # keep >= 2 grid steps when possible so both v7x TensorCores get work.
    bytes_per_img = 4 * CKK * Pp
    if block_b is None:
        block_b = max(1, min(64, (6 << 20) // bytes_per_img))
    Bt = max(1, min(block_b, B))
    if B >= 2:
        Bt = min(Bt, -(-B // 2))               # ensure G >= 2
    B_pad = _round_up(B, Bt)                   # pad batch instead of shrinking Bt
    G = B_pad // Bt

    # ---- im2col in transposed layout: (B, CKK, P), rows ordered (c, kh, kw)
    cols = []
    for kh in range(KH):
        for kw in range(KW):
            cols.append(lax.slice(x, (0, 0, kh, kw), (B, C, kh + OH, kw + OW)))
    pat = jnp.stack(cols, axis=2).reshape(B, CKK, P)
    # edge padding (duplicated valid patches / images) keeps max AND min exact
    pat = jnp.pad(pat, ((0, B_pad - B), (0, 0), (0, Pp - P)), mode="edge")
    # (G, Bt, CKK, Pp) -> (G, CKK, Bt*Pp): images side by side on the lane axis
    pat = pat.reshape(G, Bt, CKK, Pp).transpose(0, 2, 1, 3).reshape(G, CKK, Bt * Pp)

    # ---- weights: flat conv filter, split fc1, packed small operands
    wflat = wc.reshape(NK, CKK)                # same (c, kh, kw) order as patches
    w1a, w1b = params["w1"][:NK], params["w1"][NK:]
    w1pack = jnp.stack([w1a, w1b], axis=0)     # (2, NK, n1)
    # fold conv bias into fc1 bias: max/min(conv+bc) = max/min(conv)+bc, and
    # (h+bc)@w1a + (g+bc)@w1b + b1 = h@w1a + g@w1b + (b1 + bc@(w1a+w1b))
    b1_eff = params["b1"] + jnp.dot(bc, w1a + w1b, precision=lax.Precision.HIGHEST)
    Wd = _round_up(max(n1, n2), 128)
    smalls = jnp.zeros((8, Wd), jnp.float32)
    smalls = smalls.at[0, :n1].set(b1_eff)
    smalls = smalls.at[1, :n2].set(params["b2"])
    smalls = smalls.at[2, :n2].set(params["w3"][:, 0])
    smalls = smalls.at[3, 0].set(params["b3"][0])

    NO = _round_up(n2 + 1, 128)                # fused lane-dense output width

    # ---- rough VMEM estimate (double-buffered ins/outs + conv temporaries)
    est = (2 * 4 * _round_up(CKK, 8) * Bt * Pp
           + 2 * 4 * (NK * CKK + 2 * NK * n1 + n1 * n2 + 8 * Wd)
           + 2 * 4 * _round_up(Bt, 8) * NO
           + 3 * 4 * _round_up(NK, 8) * Bt * Pp)
    vmem_limit = int(min(64 << 20, max(32 << 20, 2 * est)))

    slab = pl.pallas_call(
        cnniqa_kernel,
        out_shape=jax.ShapeDtypeStruct((G, Bt, NO), jnp.float32),
        grid=(G,),
        in_specs=[
            pl.BlockSpec((1, CKK, Bt * Pp), lambda g: (g, 0, 0)),
            pl.BlockSpec((NK, CKK), lambda g: (0, 0)),
            pl.BlockSpec((2, NK, n1), lambda g: (0, 0, 0)),
            pl.BlockSpec((n1, n2), lambda g: (0, 0)),
            pl.BlockSpec((8, Wd), lambda g: (0, 0)),
        ],
        out_specs=pl.BlockSpec((1, Bt, NO), lambda g: (g, 0, 0)),
        compiler_params=pltpu.CompilerParams(
            dimension_semantics=("parallel",),
            vmem_limit_bytes=vmem_limit),
    )(pat, wflat, w1pack, params["w2"], smalls)

    flat = slab.reshape(B_pad, NO)[:B]
    q = flat[:, n2:n2 + 1]
    h = flat[:, :n2]
    return q, h


# ----------------------------------------------------------------------------
# Pure-JAX reference (for correctness check)
# ----------------------------------------------------------------------------
def cnniqa_reference(x, params):
    h = lax.conv_general_dilated(
        x, params["conv_w"], (1, 1), "VALID",
        dimension_numbers=("NCHW", "OIHW", "NCHW"),
        precision=lax.Precision.HIGHEST)
    h = h + params["conv_b"][None, :, None, None]
    h1 = jnp.max(h, axis=(2, 3))
    h2 = jnp.min(h, axis=(2, 3))
    f = jnp.concatenate([h1, h2], axis=1)
    a1 = jax.nn.relu(jnp.dot(f, params["w1"], precision=lax.Precision.HIGHEST)
                     + params["b1"])
    a2 = jax.nn.relu(jnp.dot(a1, params["w2"], precision=lax.Precision.HIGHEST)
                     + params["b2"])
    q = jnp.dot(a2, params["w3"], precision=lax.Precision.HIGHEST) + params["b3"]
    return q, a2


def make_params(key, ker_size=7, n_kers=8, n1_nodes=32, n2_nodes=32, in_ch=3):
    ks = jax.random.split(key, 8)
    s = 0.1
    return {
        "conv_w": s * jax.random.normal(ks[0], (n_kers, in_ch, ker_size, ker_size), jnp.float32),
        "conv_b": s * jax.random.normal(ks[1], (n_kers,), jnp.float32),
        "w1": s * jax.random.normal(ks[2], (2 * n_kers, n1_nodes), jnp.float32),
        "b1": s * jax.random.normal(ks[3], (n1_nodes,), jnp.float32),
        "w2": s * jax.random.normal(ks[4], (n1_nodes, n2_nodes), jnp.float32),
        "b2": s * jax.random.normal(ks[5], (n2_nodes,), jnp.float32),
        "w3": s * jax.random.normal(ks[6], (n2_nodes, 1), jnp.float32),
        "b3": s * jax.random.normal(ks[7], (1,), jnp.float32),
    }


if __name__ == "__main__":
    key = jax.random.PRNGKey(0)
    k_x, k_p = jax.random.split(key)

    # Small shapes; conv1 expects 3 input channels. B=4 -> Bt=2, grid=(2,).
    B, C, H, W = 4, 3, 16, 16
    x = jax.random.normal(k_x, (B, C, H, W), jnp.float32)
    params = make_params(k_p, ker_size=7, n_kers=8, n1_nodes=32, n2_nodes=32, in_ch=3)

    fwd = jax.jit(cnniqa_forward)
    q, h = jax.block_until_ready(fwd(x, params))
    q_ref, h_ref = cnniqa_reference(x, params)

    assert q.shape == (B, 1) and h.shape == (B, 32)
    assert jnp.allclose(q, q_ref, rtol=2e-3, atol=2e-3), \
        float(jnp.max(jnp.abs(q - q_ref)))
    assert jnp.allclose(h, h_ref, rtol=2e-3, atol=2e-3), \
        float(jnp.max(jnp.abs(h - h_ref)))
    print("KERNEL_OK")
</pallas_src>

<mosaic_0001>
module attributes {stable_mosaic.version = 11 : i64} {
  func.func @cnniqa_kernel(%arg0: i32, %arg1: memref<1x147x256xf32, #tpu.memory_space<vmem>>, %arg2: memref<8x147xf32, #tpu.memory_space<vmem>>, %arg3: memref<2x8x32xf32, #tpu.memory_space<vmem>>, %arg4: memref<32x32xf32, #tpu.memory_space<vmem>>, %arg5: memref<8x128xf32, #tpu.memory_space<vmem>>, %arg6: memref<1x2x128xf32, #tpu.memory_space<vmem>>) attributes {dimension_semantics = [#tpu.dimension_semantics<parallel>], iteration_bounds = array<i64: 2>, scalar_prefetch = 0 : i64, scratch_operands = 0 : i64, tpu.core_type = #tpu.core_type<tc>, window_params = [{transform_indices = @transform_0, window_bounds = array<i64: 1, 147, 256>}, {pipeline_mode = #tpu.pipeline_mode<synchronous>, transform_indices = @transform_1, window_bounds = array<i64: 8, 147>}, {pipeline_mode = #tpu.pipeline_mode<synchronous>, transform_indices = @transform_2, window_bounds = array<i64: 2, 8, 32>}, {pipeline_mode = #tpu.pipeline_mode<synchronous>, transform_indices = @transform_3, window_bounds = array<i64: 32, 32>}, {pipeline_mode = #tpu.pipeline_mode<synchronous>, transform_indices = @transform_4, window_bounds = array<i64: 8, 128>}, {transform_indices = @transform_5, window_bounds = array<i64: 1, 2, 128>}]} {
    %c0 = arith.constant 0 : index
    %c0_0 = arith.constant 0 : index
    %0 = vector.load %arg2[%c0, %c0_0] : memref<8x147xf32, #tpu.memory_space<vmem>>, vector<8x147xf32>
    %c0_1 = arith.constant 0 : index
    %c0_2 = arith.constant 0 : index
    %c0_3 = arith.constant 0 : index
    %1 = vector.load %arg1[%c0_1, %c0_2, %c0_3] : memref<1x147x256xf32, #tpu.memory_space<vmem>>, vector<1x147x256xf32>
    %2 = vector.shape_cast %1 : vector<1x147x256xf32> to vector<147x256xf32>
    %cst = arith.constant dense<0.000000e+00> : vector<8x256xf32>
    %3 = tpu.matmul %0, %2, %cst {dimension_numbers = #tpu.dot_dimension_numbers<[1], [0], [0], [1], [0, 0, 1, 1], [], []>} : vector<8x147xf32>, vector<147x256xf32>, vector<8x256xf32> -> vector<8x256xf32>
    %4 = vector.shape_cast %3 : vector<8x256xf32> to vector<8x2x128xf32>
    %cst_4 = arith.constant dense<0xFF800000> : vector<8x2xf32>
    %5 = vector.multi_reduction <maximumf>, %4, %cst_4 [2] : vector<8x2x128xf32> to vector<8x2xf32>
    %cst_5 = arith.constant dense<0x7F800000> : vector<8x2xf32>
    %6 = vector.multi_reduction <minimumf>, %4, %cst_5 [2] : vector<8x2x128xf32> to vector<8x2xf32>
    %c0_6 = arith.constant 0 : index
    %c0_7 = arith.constant 0 : index
    %c0_8 = arith.constant 0 : index
    %7 = vector.load %arg3[%c0_6, %c0_7, %c0_8] : memref<2x8x32xf32, #tpu.memory_space<vmem>>, vector<1x8x32xf32>
    %8 = vector.shape_cast %7 : vector<1x8x32xf32> to vector<8x32xf32>
    %cst_9 = arith.constant dense<0.000000e+00> : vector<2x32xf32>
    %9 = tpu.matmul %5, %8, %cst_9 {dimension_numbers = #tpu.dot_dimension_numbers<[0], [0], [1], [1], [0, 1, 1, 1], [], []>} : vector<8x2xf32>, vector<8x32xf32>, vector<2x32xf32> -> vector<2x32xf32>
    %c1 = arith.constant 1 : index
    %c0_10 = arith.constant 0 : index
    %c0_11 = arith.constant 0 : index
    %10 = vector.load %arg3[%c1, %c0_10, %c0_11] : memref<2x8x32xf32, #tpu.memory_space<vmem>>, vector<1x8x32xf32>
    %11 = vector.shape_cast %10 : vector<1x8x32xf32> to vector<8x32xf32>
    %cst_12 = arith.constant dense<0.000000e+00> : vector<2x32xf32>
    %12 = tpu.matmul %6, %11, %cst_12 {dimension_numbers = #tpu.dot_dimension_numbers<[0], [0], [1], [1], [0, 1, 1, 1], [], []>} : vector<8x2xf32>, vector<8x32xf32>, vector<2x32xf32> -> vector<2x32xf32>
    %13 = arith.addf %9, %12 : vector<2x32xf32>
    %c0_13 = arith.constant 0 : index
    %c0_14 = arith.constant 0 : index
    %14 = vector.load %arg5[%c0_13, %c0_14] : memref<8x128xf32, #tpu.memory_space<vmem>>, vector<1x32xf32>
    %15 = vector.broadcast %14 : vector<1x32xf32> to vector<2x32xf32>
    %16 = arith.addf %13, %15 : vector<2x32xf32>
    %cst_15 = arith.constant 0.000000e+00 : f32
    %17 = vector.broadcast %cst_15 : f32 to vector<2x32xf32>
    %18 = arith.maximumf %16, %17 : vector<2x32xf32>
    %c0_16 = arith.constant 0 : index
    %c0_17 = arith.constant 0 : index
    %19 = vector.load %arg4[%c0_16, %c0_17] : memref<32x32xf32, #tpu.memory_space<vmem>>, vector<32x32xf32>
    %cst_18 = arith.constant dense<0.000000e+00> : vector<2x32xf32>
    %20 = tpu.matmul %18, %19, %cst_18 {dimension_numbers = #tpu.dot_dimension_numbers<[1], [0], [0], [1], [0, 0, 1, 1], [], []>} : vector<2x32xf32>, vector<32x32xf32>, vector<2x32xf32> -> vector<2x32xf32>
    %c1_19 = arith.constant 1 : index
    %c0_20 = arith.constant 0 : index
    %21 = vector.load %arg5[%c1_19, %c0_20] : memref<8x128xf32, #tpu.memory_space<vmem>>, vector<1x32xf32>
    %22 = vector.broadcast %21 : vector<1x32xf32> to vector<2x32xf32>
    %23 = arith.addf %20, %22 : vector<2x32xf32>
    %cst_21 = arith.constant 0.000000e+00 : f32
    %24 = vector.broadcast %cst_21 : f32 to vector<2x32xf32>
    %25 = arith.maximumf %23, %24 : vector<2x32xf32>
    %c2 = arith.constant 2 : index
    %c0_22 = arith.constant 0 : index
    %26 = vector.load %arg5[%c2, %c0_22] : memref<8x128xf32, #tpu.memory_space<vmem>>, vector<1x32xf32>
    %27 = vector.broadcast %26 : vector<1x32xf32> to vector<2x32xf32>
    %28 = arith.mulf %25, %27 : vector<2x32xf32>
    %cst_23 = arith.constant dense<0.000000e+00> : vector<2xf32>
    %29 = vector.multi_reduction <add>, %28, %cst_23 [1] : vector<2x32xf32> to vector<2xf32>
    %30 = vector.shape_cast %29 : vector<2xf32> to vector<2x1xf32>
    %c3 = arith.constant 3 : index
    %c0_24 = arith.constant 0 : index
    %31 = vector.load %arg5[%c3, %c0_24] : memref<8x128xf32, #tpu.memory_space<vmem>>, vector<1x1xf32>
    %32 = vector.broadcast %31 : vector<1x1xf32> to vector<2x1xf32>
    %33 = arith.addf %30, %32 : vector<2x1xf32>
    %cst_25 = arith.constant 0.000000e+00 : f32
    %34 = vector.broadcast %cst_25 : f32 to vector<2x95xf32>
    %35 = tpu.concatenate %25, %33, %34 in 1 : vector<2x32xf32>, vector<2x1xf32>, vector<2x95xf32> -> vector<2x128xf32>
    %c0_26 = arith.constant 0 : index
    %c0_27 = arith.constant 0 : index
    %c0_28 = arith.constant 0 : index
    %36 = vector.load %arg6[%c0_26, %c0_27, %c0_28] : memref<1x2x128xf32, #tpu.memory_space<vmem>>, vector<1x2x128xf32>
    %37 = vector.shape_cast %36 : vector<1x2x128xf32> to vector<2x128xf32>
    %38 = vector.shape_cast %35 : vector<2x128xf32> to vector<1x2x128xf32>
    tpu.vector_store %arg6[%c0_26, %c0_27, %c0_28], %38 {strides = array<i32>} : memref<1x2x128xf32, #tpu.memory_space<vmem>>, vector<1x2x128xf32>,
    return
  }
  func.func @transform_0(%arg0: i32) -> (i32, i32, i32) {
    %c0_i32 = arith.constant 0 : i32
    %c0_i32_0 = arith.constant 0 : i32
    %c0_i32_1 = arith.constant 0 : i32
    return %arg0, %c0_i32, %c0_i32_0 : i32, i32, i32
  }
  func.func @transform_1(%arg0: i32) -> (i32, i32) {
    %c0_i32 = arith.constant 0 : i32
    %c0_i32_0 = arith.constant 0 : i32
    %c0_i32_1 = arith.constant 0 : i32
    return %c0_i32, %c0_i32_0 : i32, i32
  }
  func.func @transform_2(%arg0: i32) -> (i32, i32, i32) {
    %c0_i32 = arith.constant 0 : i32
    %c0_i32_0 = arith.constant 0 : i32
    %c0_i32_1 = arith.constant 0 : i32
    %c0_i32_2 = arith.constant 0 : i32
    return %c0_i32, %c0_i32_0, %c0_i32_1 : i32, i32, i32
  }
  func.func @transform_3(%arg0: i32) -> (i32, i32) {
    %c0_i32 = arith.constant 0 : i32
    %c0_i32_0 = arith.constant 0 : i32
    %c0_i32_1 = arith.constant 0 : i32
    return %c0_i32, %c0_i32_0 : i32, i32
  }
  func.func @transform_4(%arg0: i32) -> (i32, i32) {
    %c0_i32 = arith.constant 0 : i32
    %c0_i32_0 = arith.constant 0 : i32
    %c0_i32_1 = arith.constant 0 : i32
    return %c0_i32, %c0_i32_0 : i32, i32
  }
  func.func @transform_5(%arg0: i32) -> (i32, i32, i32) {
    %c0_i32 = arith.constant 0 : i32
    %c0_i32_0 = arith.constant 0 : i32
    %c0_i32_1 = arith.constant 0 : i32
    return %arg0, %c0_i32, %c0_i32_0 : i32, i32, i32
  }
}

</mosaic_0001>

<bundles_post_ra>
// kernel: cnniqa_forward.1
= control target key start
LH: loop header
LB: loop body
LE: loop exit
PB: predicated region body
PF: predicated region fallthrough
CT: control target
= control target key end

     0   :  { %s808_s18 = smov 0   ;;  %s951_s0 = inlined_call_operand.vmem [shape: f32[2,147,256], index: 0, kind: input, shape index: {}]   ;;  %s952_s1 = inlined_call_operand.vmem [shape: f32[8,147], index: 1, kind: input, shape index: {}]   ;;  %s953_s2 = inlined_call_operand.vmem [shape: f32[2,8,32], index: 2, kind: input, shape index: {}]   ;;  %s954_s3 = inlined_call_operand.vmem [shape: f32[32,32], index: 3, kind: input, shape index: {}]   ;;  %s955_s4 = inlined_call_operand.vmem [shape: f32[8,128], index: 4, kind: input, shape index: {}]   ;;  %s956_s5 = inlined_call_operand.vmem [shape: f32[2,2,128], index: 5, kind: output, shape index: {}]  }
   0x1 LB: > { %s733_s19 = sadd.s32 4294967295, %s773_s18   ;;  %p737_p0 = scmp.ge.s32.totalorder %s773_s18, 1  ;;  %s773_s18 = sphi %s808_s18, %s15_s18  }
   0x2   : > { %p187_p1 = scmp.lt.s32.totalorder %s773_s18, 3 }
   0x4   : > { %p188_p2 = pnand %p737_p0, %p187_p1 }
   0x5   : > { %p214_p3 = scmp.lt.s32.totalorder (!%p188_p2), %s733_s19, 1  ;;  %s777_s25 = smov (!%p188_p2), 32  }
   0x6   : > { %191 = sbr.rel (%p188_p2) target bundleno = 1006 (0x3ee), region = 40 }
   0xb   : > { %s958_s19 = smov (!%p214_p3, %s733_s19), 1  ;;  %vm267_vm0 = vcmask 1042432   ;;  %v224_v21 = vld [vmem:[%s952_s1 + $0x8] sm:$0xff]  ;;  %vm263_vm1 = vcmask 154624   ;;  %v223_v39 = vld [vmem:[%s952_s1] sm:$0xff]  ;;  %vm355_vm2 = vcmask 1047556  }
   0xc   : > { %s750_s20 = smul.u32 304, %s958_s19  ;;  %v775_v40 = vmov 1983009808   ;;  %v776_v49 = vmov 1934713408   ;;  %vm407_vm3 = vcmask 1041408  }
   0xd   : > { %v358_v41 = vunpack.c.l.s4 %v775_v40  ;;  %v380_v50 = vunpack.c.l.s4 %v776_v49  ;;  %v744_v40 = vld [vmem:[%s953_s2 + $0x8] sm:$0xff]  ;;  %vm477_vm4 = vcmask 1041409   ;;  %vm479_vm5 = vcmask 1042434   ;;  %s739_s26 = sshll.u32 %s958_s19, 1 }
   0xe   : > { %s822_s23 = scalar_lea.vmem %s951_s0, %s750_s20  ;;  %vm481_vm6 = vcmask 1043459   ;;  %vm483_vm7 = vcmask 1044484   ;;  %vm485_vm8 = vcmask 1045509   ;;  %vm487_vm9 = vcmask 1046534   ;;  %s222_s29 = scalar_lea.vmem %s956_s5, %s739_s26 }
   0xf   : > { %v256_v0 = vld [vmem:[%s822_s23 + $0xf8] sm:$0xff]  ;;  %v254_v1 = vld [vmem:[%s822_s23 + $0xe8] sm:$0xff]  ;;  %v255_v2 = vld [vmem:[%s822_s23 + $0xf0] sm:$0xff]  ;;  %v359_v43 = vunpack.c.0.s8 %v358_v41  ;;  %v381_v55 = vunpack.c.0.s8 %v380_v50  ;;  %vm489_vm10 = vcmask 1047559   ;;  %vm524_vm11 = vcmask 64512  }
  0x10   : > { %314 = vmatpush.msra.mxu2 %v256_v0  ;;  %274 = vmatpush.msra.mxu0 %v255_v2  ;;  %v253_v3 = vld [vmem:[%s822_s23 + $0xe0] sm:$0xff]  ;;  %v252_v4 = vld [vmem:[%s822_s23 + $0xd8] sm:$0xff]  ;;  %v251_v5 = vld [vmem:[%s822_s23 + $0xd0] sm:$0xff]  ;;  %vm637_vm12 = vcmask 261120   ;;  %vm665_vm13 = vcmask 254976   ;;  %vm677_vm14 = vcmask 269312  }
  0x11   : > { %v250_v6 = vld [vmem:[%s822_s23 + $0xc8] sm:$0xff]  ;;  %v249_v7 = vld [vmem:[%s822_s23 + $0xc0] sm:$0xff]  ;;  %v248_v8 = vld [vmem:[%s822_s23 + $0xb8] sm:$0xff] }
  0x12   : > { %315 = vmatpush.msra.mxu2 %v254_v1  ;;  %275 = vmatpush.msra.mxu0 %v253_v3  ;;  %v247_v9 = vld [vmem:[%s822_s23 + $0xb0] sm:$0xff]  ;;  %v246_v10 = vld [vmem:[%s822_s23 + $0xa8] sm:$0xff]  ;;  %v245_v11 = vld [vmem:[%s822_s23 + $0xa0] sm:$0xff] }
  0x13   : > { %v262_v12 = vld [vmem:[%s822_s23 + $0x128] sm:$0x7]  ;;  %v260_v13 = vld [vmem:[%s822_s23 + $0x118] sm:$0xff]  ;;  %v243_v15 = vld [vmem:[%s822_s23 + $0x90] sm:$0xff] }
  0x14   : > { %316 = vmatpush.msra.mxu2 %v252_v4  ;;  %276 = vmatpush.msra.mxu0 %v251_v5  ;;  %v244_v14 = vld [vmem:[%s822_s23 + $0x98] sm:$0xff]  ;;  %v261_v16 = vld [vmem:[%s822_s23 + $0x120] sm:$0x7]  ;;  %v258_v17 = vld [vmem:[%s822_s23 + $0x108] sm:$0xff] }
  0x15   : > { %742 = vmatpush.msk.msra.mxu3 %vm267_vm0, %v262_v12  ;;  %v259_v18 = vld [vmem:[%s822_s23 + $0x110] sm:$0xff]  ;;  %v242_v19 = vld [vmem:[%s822_s23 + $0x88] sm:$0xff]  ;;  %v241_v20 = vld [vmem:[%s822_s23 + $0x80] sm:$0xff]  ;;  %740 = vmatpush.msk.msra.mxu1 %vm267_vm0, %v261_v16 }
  0x16   : > { %317 = vmatpush.msra.mxu2 %v250_v6  ;;  %277 = vmatpush.msra.mxu0 %v249_v7  ;;  %v257_v22 = vld [vmem:[%s822_s23 + $0x100] sm:$0xff]  ;;  %v240_v23 = vld [vmem:[%s822_s23 + $0x78] sm:$0xff]  ;;  %v239_v24 = vld [vmem:[%s822_s23 + $0x70] sm:$0xff] }
  0x17   : > { %348 = vmatpush.msra.mxu3 %v260_v13  ;;  %308 = vmatpush.msra.mxu1 %v259_v18  ;;  %v238_v25 = vld [vmem:[%s822_s23 + $0x68] sm:$0xff]  ;;  %v237_v26 = vld [vmem:[%s822_s23 + $0x60] sm:$0xff]  ;;  %v236_v27 = vld [vmem:[%s822_s23 + $0x58] sm:$0xff] }
  0x18   : > { %318 = vmatpush.msra.mxu2 %v248_v8  ;;  %278 = vmatpush.msra.mxu0 %v247_v9  ;;  %v235_v28 = vld [vmem:[%s822_s23 + $0x50] sm:$0xff]  ;;  %v234_v29 = vld [vmem:[%s822_s23 + $0x48] sm:$0xff]  ;;  %v233_v30 = vld [vmem:[%s822_s23 + $0x40] sm:$0xff] }
  0x19   : > { %349 = vmatpush.msra.mxu3 %v258_v17  ;;  %309 = vmatpush.msra.mxu1 %v257_v22  ;;  %v232_v31 = vld [vmem:[%s822_s23 + $0x38] sm:$0xff]  ;;  %v231_v32 = vld [vmem:[%s822_s23 + $0x30] sm:$0xff]  ;;  %v230_v33 = vld [vmem:[%s822_s23 + $0x28] sm:$0xff] }
  0x1a   : > { %319 = vmatpush.msra.mxu2 %v246_v10  ;;  %279 = vmatpush.msra.mxu0 %v245_v11  ;;  %v229_v34 = vld [vmem:[%s822_s23 + $0x20] sm:$0xff]  ;;  %v228_v35 = vld [vmem:[%s822_s23 + $0x18] sm:$0xff]  ;;  %v227_v36 = vld [vmem:[%s822_s23 + $0x10] sm:$0xff] }
  0x1b   : > { %743 = vmatmul.msk.f32.vlgmr.msra.gmra.mxu3 %vm263_vm1, %v224_v21  ;;  %741 = vmatmul.msk.f32.vlgmr.msra.gmra.mxu1 %vm263_vm1, %v224_v21  ;;  %v226_v37 = vld [vmem:[%s822_s23 + $0x8] sm:$0xff]  ;;  %v225_v38 = vld [vmem:[%s822_s23] sm:$0xff] }
  0x1c   : > { %320 = vmatpush.msra.mxu2 %v244_v14  ;;  %280 = vmatpush.msra.mxu0 %v243_v15 }
  0x1d   : > { %543 = vmatpush.msrb.mxu1 %v744_v40 }
  0x1e   : > { %321 = vmatpush.msra.mxu2 %v242_v19  ;;  %281 = vmatpush.msra.mxu0 %v241_v20 }
  0x20   : > { %322 = vmatpush.msra.mxu2 %v240_v23  ;;  %282 = vmatpush.msra.mxu0 %v239_v24 }
  0x22   : > { %323 = vmatpush.msra.mxu2 %v238_v25  ;;  %283 = vmatpush.msra.mxu0 %v237_v26 }
  0x24   : > { %324 = vmatpush.msra.mxu2 %v236_v27  ;;  %284 = vmatpush.msra.mxu0 %v235_v28 }
  0x26   : > { %325 = vmatpush.msra.mxu2 %v234_v29  ;;  %285 = vmatpush.msra.mxu0 %v233_v30 }
  0x28   : > { %326 = vmatpush.msra.mxu2 %v232_v31  ;;  %286 = vmatpush.msra.mxu0 %v231_v32 }
  0x2a   : > { %327 = vmatpush.msra.mxu2 %v230_v33  ;;  %287 = vmatpush.msra.mxu0 %v229_v34 }
  0x2c   : > { %328 = vmatpush.msra.mxu2 %v228_v35  ;;  %288 = vmatpush.msra.mxu0 %v227_v36 }
  0x2e   : > { %329 = vmatpush.msra.mxu2 %v226_v37  ;;  %289 = vmatpush.msra.mxu0 %v225_v38  ;;  %v467_v38 = vlaneseq }
  0x2f   : > { %330 = vmatmul.f32.vlgmr.msra.gmra.mxu2 %v223_v39  ;;  %290 = vmatmul.f32.vlgmr.msra.gmra.mxu0 %v223_v39  ;;  %v456_v39 = vld [vmem:[%s953_s2] sm:$0xff] }
  0x30   : > { %622 = vmatpush.msrb.mxu3 %v456_v39  ;;  %v468_v41 = vand.u32 127, %v467_v38 }
  0x98   : > { %v311_v42 = vpop.f32.mrf.mxu1 }
  0x9e   : > { %v351_v48 = vpop.f32.mrf.mxu3 }
  0xac   : > { %v291_v44 = vpop.f32.mrf.mxu0 }
  0xad   : > { %v312_v45 = vadd.f32 %v311_v42, %v291_v44 }
  0xaf   : > { %v354_v46 = vrot.slane %v312_v45, 4  ;;  %v360_v47 = vperm.slane %v312_v45, %v359_v43 }
  0xb1   : > { %v356_v51 = vsel %vm355_vm2, 0.0, %v354_v46  ;;  %v377_v53 = vrot.slane %v360_v47, 4 }
  0xb2   : > { %v331_v52 = vpop.f32.mrf.mxu2  ;;  %v364_v56 = vperm.slane %v356_v51, %v359_v43 }
  0xb3   : > { %v352_v54 = vadd.f32 %v351_v48, %v331_v52 }
  0xb4   : > { %v389_v63 = vrot.slane %v364_v56, 4 }
  0xb5   : > { %v365_v57 = vrot.slane %v352_v54, 4  ;;  %v370_v58 = vperm.slane %v352_v54, %v359_v43 }
  0xb7   : > { %v366_v59 = vsel %vm355_vm2, 0.0, %v365_v57  ;;  %v375_v60 = vrot.slane %v370_v58, 4  ;;  %v378_v61 = vsel %vm355_vm2, %v370_v58, %v377_v53 }
  0xb8   : > { %v386_v62 = vperm.slane %v378_v61, %v381_v55  ;;  %v374_v0 = vperm.slane %v366_v59, %v359_v43 }
  0xb9   : > { %v376_v1 = vsel %vm355_vm2, %v375_v60, %v360_v47 }
  0xba   : > { %v414_v2 = vsel %vm407_vm3, %v386_v62, -inf  ;;  %v382_v3 = vperm.slane %v376_v1, %v381_v55  ;;  %v401_v6 = vrot.slane %v386_v62, 4  ;;  %v390_v7 = vsel %vm355_vm2, %v374_v0, %v389_v63 }
  0xbb   : > { %415 = vmax.xlane.f32.xlu1 %v414_v2  ;;  %v398_v8 = vperm.slane %v390_v7, %v381_v55  ;;  %v387_v9 = vrot.slane %v374_v0, 4  ;;  %v438_v11 = vsel %vm407_vm3, %v386_v62, inf }
  0xbc   : > { %v432_v4 = vsel %vm407_vm3, %v382_v3, inf  ;;  %v408_v5 = vsel %vm407_vm3, %v382_v3, -inf  ;;  %v402_v10 = vsel %vm355_vm2, 0.0, %v401_v6  ;;  %v399_v14 = vrot.slane %v382_v3, 4 }
  0xbd   : > { %433 = vmin.xlane.f32.xlu2 %v432_v4  ;;  %409 = vmax.xlane.f32.xlu0 %v408_v5  ;;  %v441_v12 = vsel %vm407_vm3, %v402_v10, inf  ;;  %v426_v13 = vsel %vm407_vm3, %v398_v8, -inf  ;;  %v388_v15 = vsel %vm355_vm2, %v387_v9, %v364_v56  ;;  %v417_v18 = vsel %vm407_vm3, %v402_v10, -inf }
  0xbe   : > { %v394_v16 = vperm.slane %v388_v15, %v381_v55  ;;  %v400_v17 = vsel %vm355_vm2, 0.0, %v399_v14  ;;  %v405_v19 = vrot.slane %v398_v8, 4  ;;  %v450_v30 = vsel %vm407_vm3, %v398_v8, inf }
  0xbf   : > { %v411_v20 = vsel %vm407_vm3, %v400_v17, -inf  ;;  %v435_v26 = vsel %vm407_vm3, %v400_v17, inf }
  0xc0   : > { %v420_v21 = vsel %vm407_vm3, %v394_v16, -inf  ;;  %v403_v22 = vrot.slane %v394_v16, 4  ;;  %v406_v23 = vsel %vm355_vm2, 0.0, %v405_v19  ;;  %v444_v29 = vsel %vm407_vm3, %v394_v16, inf }
  0xc1   : > { %v429_v25 = vsel %vm407_vm3, %v406_v23, -inf  ;;  %v453_v31 = vsel %vm407_vm3, %v406_v23, inf  ;;  %v631_v23 = vld [vmem:[%s954_s3] sm:$0xff] }
  0xc2   : > { %v404_v24 = vsel %vm355_vm2, 0.0, %v403_v22  ;;  %v632_v22 = vld [vmem:[%s954_s3 + $0x8] sm:$0xff] }
  0xc3   : > { %439 = vmin.xlane.f32.xlu1 %v438_v11  ;;  %v423_v27 = vsel %vm407_vm3, %v404_v24, -inf  ;;  %v447_v28 = vsel %vm407_vm3, %v404_v24, inf }
  0xc5   : > { %442 = vmin.xlane.f32.xlu2 %v441_v12  ;;  %427 = vmax.xlane.f32.xlu0 %v426_v13 }
  0xcb   : > { %418 = vmax.xlane.f32.xlu1 %v417_v18  ;;  %v634_v18 = vld [vmem:[%s954_s3 + $0x18] sm:$0xff] }
  0xcc   : > { %653 = vmatpush.msra.mxu1 %v634_v18 }
  0xcd   : > { %412 = vmax.xlane.f32.xlu0 %v411_v20  ;;  %421 = vmax.xlane.f32.xlu2 %v420_v21  ;;  %v633_v21 = vld [vmem:[%s954_s3 + $0x10] sm:$0xff] }
  0xce   : > { %654 = vmatpush.msra.mxu1 %v633_v21 }
  0xd0   : > { %655 = vmatpush.msra.mxu1 %v632_v22 }
  0xd2   : > { %656 = vmatpush.msra.mxu1 %v631_v23 }
  0xd3   : > { %430 = vmax.xlane.f32.xlu1 %v429_v25  ;;  %v763_v25 = vld [vmem:[%s955_s4] ss:$0 sm:$0xff] }
  0xd5   : > { %436 = vmin.xlane.f32.xlu0 %v435_v26  ;;  %424 = vmax.xlane.f32.xlu2 %v423_v27 }
  0xdb   : > { %448 = vmin.xlane.f32.xlu1 %v447_v28 }
  0xdd   : > { %445 = vmin.xlane.f32.xlu0 %v444_v29  ;;  %451 = vmin.xlane.f32.xlu2 %v450_v30  ;;  %v764_v30 = vld [vmem:[%s955_s4 + $0x1] ss:$0 sm:$0xff] }
  0xe5   : > { %454 = vmin.xlane.f32.xlu0 %v453_v31 }
 0x12e   : > { %v416_v32 = vpop.xlane.xlu1 %415 }
 0x12f   : > { %v558_v47 = vperm.slane %v416_v32, %v468_v41 }
 0x130   : > { %v434_v33 = vpop.xlane.xlu2 %433  ;;  %v410_v34 = vpop.xlane.xlu0 %409 }
 0x131   : > { %v556_v45 = vperm.slane %v410_v34, %v468_v41  ;;  %v469_v60 = vperm.slane %v434_v33, %v468_v41  ;;  %v765_v33 = vld [vmem:[%s955_s4 + $0x2] ss:$0 sm:$0xff] }
 0x136   : > { %v440_v35 = vpop.xlane.xlu1 %439 }
 0x137   : > { %v471_v2 = vperm.slane %v440_v35, %v468_v41 }
 0x138   : > { %v443_v36 = vpop.xlane.xlu2 %442  ;;  %v428_v37 = vpop.xlane.xlu0 %427 }
 0x139   : > { %v562_v58 = vperm.slane %v428_v37, %v468_v41  ;;  %v472_v5 = vperm.slane %v443_v36, %v468_v41  ;;  %v766_v37 = vld [vmem:[%s955_s4 + $0x3] ss:$0 sm:$0xff] }
 0x13e   : > { %v419_v42 = vpop.xlane.xlu1 %418 }
 0x13f   : > { %v559_v50 = vperm.slane %v419_v42, %v468_v41 }
 0x140   : > { %v413_v43 = vpop.xlane.xlu0 %412  ;;  %v422_v44 = vpop.xlane.xlu2 %421 }
 0x141   : > { %v557_v46 = vperm.slane %v413_v43, %v468_v41  ;;  %v560_v53 = vperm.slane %v422_v44, %v468_v41 }
 0x143   : > { %v564_v48 = vsel %vm477_vm4, %v557_v46, %v556_v45 }
 0x144   : > { %v565_v49 = vsel %vm479_vm5, %v558_v47, %v564_v48 }
 0x145   : > { %v566_v51 = vsel %vm481_vm6, %v559_v50, %v565_v49 }
 0x146   : > { %v431_v52 = vpop.xlane.xlu1 %430  ;;  %v567_v59 = vsel %vm483_vm7, %v560_v53, %v566_v51 }
 0x147   : > { %v563_v61 = vperm.slane %v431_v52, %v468_v41 }
 0x148   : > { %v437_v54 = vpop.xlane.xlu0 %436  ;;  %v425_v55 = vpop.xlane.xlu2 %424 }
 0x149   : > { %v470_v56 = vperm.slane %v437_v54, %v468_v41  ;;  %v561_v57 = vperm.slane %v425_v55, %v468_v41 }
 0x14b   : > { %v568_v62 = vsel %vm485_vm8, %v561_v57, %v567_v59  ;;  %v478_v0 = vsel %vm477_vm4, %v470_v56, %v469_v60 }
 0x14c   : > { %v569_v63 = vsel %vm487_vm9, %v562_v58, %v568_v62  ;;  %v480_v3 = vsel %vm479_vm5, %v471_v2, %v478_v0 }
 0x14d   : > { %v570_v1 = vsel %vm489_vm10, %v563_v61, %v569_v63  ;;  %v482_v8 = vsel %vm481_vm6, %v472_v5, %v480_v3 }
 0x14e   : > { %572 = vxpose.xlu1.b32.start.end [1/1] (short) (narrow) %v570_v1, 8  ;;  %v449_v7 = vpop.xlane.xlu1 %448 }
 0x14f   : > { %v474_v10 = vperm.slane %v449_v7, %v468_v41 }
 0x150   : > { %v446_v4 = vpop.xlane.xlu0 %445  ;;  %v452_v11 = vpop.xlane.xlu2 %451 }
 0x151   : > { %v473_v6 = vperm.slane %v446_v4, %v468_v41  ;;  %v475_v13 = vperm.slane %v452_v11, %v468_v41 }
 0x153   : > { %v484_v9 = vsel %vm483_vm7, %v473_v6, %v482_v8 }
 0x154   : > { %v486_v12 = vsel %vm485_vm8, %v474_v10, %v484_v9 }
 0x155   : > { %v488_v16 = vsel %vm487_vm9, %v475_v13, %v486_v12 }
 0x158   : > { %v455_v14 = vpop.xlane.xlu0 %454 }
 0x159   : > { %v476_v15 = vperm.slane %v455_v14, %v468_v41 }
 0x15b   : > { %v490_v17 = vsel %vm489_vm10, %v476_v15, %v488_v16 }
 0x15c   : > { %492 = vxpose.xlu2.b32.start.end [1/1] (short) (narrow) %v490_v17, 8 }
 0x1f2   : > { %v588_v19 = vpop.trf.xlu1 }
 0x1f3   : > { %746 = vmatmul.msk.f32.vlgmr.msrb.gmra.mxu3 %vm524_vm11, %v588_v19 }
 0x1f5   : > { %v508_v20 = vpop.trf.xlu2 }
 0x1f6   : > { %745 = vmatmul.msk.f32.vlgmr.msrb.gmra.mxu1 %vm524_vm11, %v508_v20 }
 0x273   : > { %v545_v24 = vpop.f32.mrf.mxu1 }
 0x276   : > { %v624_v26 = vpop.f32.mrf.mxu3 }
 0x277   : > { %v625_v27 = vadd.f32 %v624_v26, %v545_v24 }
 0x279   : > { %v629_v28 = vadd.f32 %v763_v25, %v625_v27 }
 0x27b   : > { %v630_v29 = vmax.f32 %v629_v28, 0.0 }
 0x27d   : > { %747 = vmatmul.msk.f32.vlgmr.msra.gmra.mxu1 %vm637_vm12, %v630_v29 }
 0x2fa   : > { %v658_v31 = vpop.f32.mrf.mxu1 }
 0x2fb   : > { %v659_v32 = vadd.f32 %v764_v30, %v658_v31 }
 0x2fd   : > { %v661_v34 = vmax.f32 %v659_v32, 0.0 }
 0x2ff   : > { %v664_v35 = vmul.f32 %v765_v33, %v661_v34 }
 0x301   : > { %v666_v36 = vsel %vm665_vm13, %v664_v35, 0.0 }
 0x302   : > { %667 = vadd.xlane.f32.xlu0 %v666_v36 }
 0x375   : > { %v668_v38 = vpop.xlane.xlu0 %667 }
 0x376   : > { %v671_v39 = vadd.f32 %v766_v37, %v668_v38 }
 0x378   : > { %673 = vrot.lane.b32.xlu0 %v671_v39, %s777_s25 }
 0x3ea   : > { %v674_v40 = vpop.permute.xlu0 %673 }
 0x3eb   : > { %v676_v41 = vsel %vm637_vm12, %v661_v34, %v674_v40 }
 0x3ec   : > { %v678_v42 = vsel %vm677_vm14, %v676_v41, 0.0 }
 0x3ed   : > { %679 = vst [vmem:[%s222_s29] sm:$0x3] %v678_v42 }
 0x3ee PF: > { %s15_s18 = sadd.s32 1, %s773_s18  }
 0x3ef   : > { %p12_p4 = scmp.ge.s32.totalorder %s15_s18, 4  }
 0x3f1   :  { %14 = sbr.rel (!%p12_p4) target bundleno = 1 (0x1), region = 71 }

</bundles_post_ra>
